<compile_context>
chip_gen: v7x
topology: tpu7x:2x2x1
jax: 0.10.0
libtpu: 0.0.40
codegen_flags: <defaults>
</compile_context>

<pallas_src>
import jax
import jax.numpy as jnp
from jax.experimental import pallas as pl
from jax.experimental.pallas import tpu as pltpu

EPS = 1e-5  # nn.BatchNorm2d default eps


def _pick_tile(total, candidates):
    """Largest candidate that evenly divides `total`, else full extent."""
    for c in candidates:
        if c <= total and total % c == 0:
            return c
    return total


def bottleneck_forward(x_nchw, gamma3, beta3):
    """x_nchw: (N, C, H, W) with C == planes*4.  Returns same shape/dtype."""
    N, C, H, W = x_nchw.shape
    HW = H * W
    x3d = x_nchw.reshape(N, C, HW)                      # free, native NCHW view
    g3d = gamma3.reshape(1, C, 1).astype(jnp.float32)   # C on the sublane axis
    b3d = beta3.reshape(1, C, 1).astype(jnp.float32)

    # Tile sizes: lane-dense last dim (multiple of 128 when possible), ~1 MiB
    # x-block so double-buffered in+out fits every generation's VMEM budget.
    thw = _pick_tile(HW, (2048, 1024, 512, 256, 128))
    tn_target = max(1, (1 << 20) // max(1, C * thw * 4))
    tn = 1
    for d in range(1, N + 1):
        if N % d == 0 and d <= tn_target:
            tn = d
    grid = (N // tn, HW // thw)
    inv_count = 1.0 / float(N * HW)

    # ---------------- phase 1: per-channel stats -> folded scale/shift -------
    def stats_kernel(x_ref, g_ref, b_ref, scale_ref, shift_ref, sum_ref, sq_ref):
        first = (pl.program_id(0) == 0) & (pl.program_id(1) == 0)
        last = ((pl.program_id(0) == pl.num_programs(0) - 1)
                & (pl.program_id(1) == pl.num_programs(1) - 1))

        @pl.when(first)
        def _():
            sum_ref[...] = jnp.zeros_like(sum_ref)
            sq_ref[...] = jnp.zeros_like(sq_ref)

        x = x_ref[...].astype(jnp.float32)                       # (tn, C, thw)
        # lane reduce (XLU) then batch-tile reduce; keep C on sublanes.
        ps = jnp.sum(jnp.sum(x, axis=2, keepdims=True), axis=0, keepdims=True)
        pq = jnp.sum(jnp.sum(x * x, axis=2, keepdims=True), axis=0, keepdims=True)
        sum_ref[...] += ps                                        # (1, C, 1)
        sq_ref[...] += pq

        @pl.when(last)
        def _():
            mean = sum_ref[...] * inv_count
            var = sq_ref[...] * inv_count - mean * mean           # biased var
            inv_std = jax.lax.rsqrt(var + EPS)                    # EUP rsqrt
            scale = g_ref[...] * inv_std
            scale_ref[...] = scale + 1.0                          # folds "+ residual"
            shift_ref[...] = b_ref[...] - mean * scale

    scale_p1, shift = pl.pallas_call(
        stats_kernel,
        out_shape=(jax.ShapeDtypeStruct((1, C, 1), jnp.float32),
                   jax.ShapeDtypeStruct((1, C, 1), jnp.float32)),
        grid_spec=pltpu.PrefetchScalarGridSpec(
            num_scalar_prefetch=0,
            grid=grid,
            in_specs=[
                pl.BlockSpec((tn, C, thw), lambda i, j: (i, 0, j)),
                pl.BlockSpec((1, C, 1), lambda i, j: (0, 0, 0)),
                pl.BlockSpec((1, C, 1), lambda i, j: (0, 0, 0)),
            ],
            out_specs=[
                pl.BlockSpec((1, C, 1), lambda i, j: (0, 0, 0)),
                pl.BlockSpec((1, C, 1), lambda i, j: (0, 0, 0)),
            ],
            scratch_shapes=[pltpu.VMEM((1, C, 1), jnp.float32),
                            pltpu.VMEM((1, C, 1), jnp.float32)],
        ),
        compiler_params=pltpu.CompilerParams(
            dimension_semantics=("arbitrary", "arbitrary")),
    )(x3d, g3d, b3d)

    # ---------------- phase 2: out = relu(x*(scale+1) + shift) ---------------
    def normalize_kernel(x_ref, scale_ref, shift_ref, o_ref):
        x = x_ref[...].astype(jnp.float32)                        # (tn, C, thw)
        out = x * scale_ref[...] + shift_ref[...]                 # 2 VPU ops/elem
        o_ref[...] = jnp.maximum(out, 0.0).astype(o_ref.dtype)

    out3d = pl.pallas_call(
        normalize_kernel,
        out_shape=jax.ShapeDtypeStruct((N, C, HW), x_nchw.dtype),
        grid_spec=pltpu.PrefetchScalarGridSpec(
            num_scalar_prefetch=0,
            grid=grid,
            in_specs=[
                pl.BlockSpec((tn, C, thw), lambda i, j: (i, 0, j)),
                pl.BlockSpec((1, C, 1), lambda i, j: (0, 0, 0)),
                pl.BlockSpec((1, C, 1), lambda i, j: (0, 0, 0)),
            ],
            out_specs=pl.BlockSpec((tn, C, thw), lambda i, j: (i, 0, j)),
        ),
        compiler_params=pltpu.CompilerParams(
            dimension_semantics=("parallel", "parallel")),
    )(x3d, scale_p1, shift)

    return out3d.reshape(N, C, H, W)


if __name__ == "__main__":
    # Module config (small): planes=4 -> inplanes = planes*4 = 16, stride=1.
    planes = 4
    inplanes = planes * 4
    N, H, W = 2, 16, 16

    key = jax.random.PRNGKey(0)
    kx, k1, k2, k3, kg, kb = jax.random.split(key, 6)

    # Only bn3's affine params reach the output in the reference forward;
    # conv weights are dead code in forward() and are discarded.
    w_conv1 = 0.01 * jax.random.normal(k1, (planes, inplanes, 1, 1), jnp.float32)
    w_conv2 = 0.01 * jax.random.normal(k2, (planes, inplanes, 3, 3), jnp.float32)
    w_conv3 = 0.01 * jax.random.normal(k3, (planes, inplanes, 1, 1), jnp.float32)
    gamma3 = 1.0 + 0.1 * jax.random.normal(kg, (inplanes,), jnp.float32)  # bn3 weight
    beta3 = 0.1 * jax.random.normal(kb, (inplanes,), jnp.float32)         # bn3 bias
    del w_conv1, w_conv2, w_conv3  # discarded by the reference forward

    x = jax.random.normal(kx, (N, inplanes, H, W), jnp.float32)

    out = bottleneck_forward(x, gamma3, beta3)
    out = jax.block_until_ready(out)

    # Pure-JAX reference of the literal forward semantics (two-pass stats).
    x2d = jnp.transpose(x, (0, 2, 3, 1)).reshape(-1, inplanes)
    mean = x2d.mean(axis=0)
    var = ((x2d - mean) ** 2).mean(axis=0)
    bn = (x2d - mean) / jnp.sqrt(var + EPS) * gamma3 + beta3
    ref2d = jnp.maximum(bn + x2d, 0.0)
    ref = jnp.transpose(ref2d.reshape(N, H, W, inplanes), (0, 3, 1, 2))

    assert out.shape == x.shape and out.dtype == x.dtype
    assert jnp.allclose(out, ref, atol=1e-3, rtol=1e-3), "mismatch vs reference"
    print("KERNEL_OK")
</pallas_src>

<mosaic_0001>
module attributes {stable_mosaic.version = 11 : i64} {
  func.func @stats_kernel(%arg0: i32, %arg1: i32, %arg2: memref<2x16x256xf32, #tpu.memory_space<vmem>>, %arg3: memref<1x16x1xf32, #tpu.memory_space<vmem>>, %arg4: memref<1x16x1xf32, #tpu.memory_space<vmem>>, %arg5: memref<1x16x1xf32, #tpu.memory_space<vmem>>, %arg6: memref<1x16x1xf32, #tpu.memory_space<vmem>>, %arg7: memref<1x16x1xf32, #tpu.memory_space<vmem>>, %arg8: memref<1x16x1xf32, #tpu.memory_space<vmem>>) attributes {dimension_semantics = [#tpu.dimension_semantics<arbitrary>, #tpu.dimension_semantics<arbitrary>], iteration_bounds = array<i64: 1, 1>, scalar_prefetch = 0 : i64, scratch_operands = 2 : i64, tpu.core_type = #tpu.core_type<tc>, window_params = [{transform_indices = @transform_0, window_bounds = array<i64: 2, 16, 256>}, {pipeline_mode = #tpu.pipeline_mode<synchronous>, transform_indices = @transform_1, window_bounds = array<i64: 1, 16, 1>}, {pipeline_mode = #tpu.pipeline_mode<synchronous>, transform_indices = @transform_2, window_bounds = array<i64: 1, 16, 1>}, {pipeline_mode = #tpu.pipeline_mode<synchronous>, transform_indices = @transform_3, window_bounds = array<i64: 1, 16, 1>}, {pipeline_mode = #tpu.pipeline_mode<synchronous>, transform_indices = @transform_4, window_bounds = array<i64: 1, 16, 1>}]} {
    %c0_i32 = arith.constant 0 : i32
    %0 = arith.cmpi eq, %arg0, %c0_i32 : i32
    %c0_i32_0 = arith.constant 0 : i32
    %1 = arith.cmpi eq, %arg1, %c0_i32_0 : i32
    %2 = arith.andi %0, %1 : i1
    %c0_i32_1 = arith.constant 0 : i32
    %3 = arith.cmpi eq, %arg0, %c0_i32_1 : i32
    %c0_i32_2 = arith.constant 0 : i32
    %4 = arith.cmpi eq, %arg1, %c0_i32_2 : i32
    %5 = arith.andi %3, %4 : i1
    %6 = arith.extui %2 : i1 to i32
    %c0_i32_3 = arith.constant 0 : i32
    %7 = arith.cmpi ne, %6, %c0_i32_3 : i32
    scf.if %7 {
      %cst_22 = arith.constant 0.000000e+00 : f32
      %26 = vector.broadcast %cst_22 : f32 to vector<1x16x1xf32>
      %c0_23 = arith.constant 0 : index
      %c0_24 = arith.constant 0 : index
      %c0_25 = arith.constant 0 : index
      %27 = vector.load %arg7[%c0_23, %c0_24, %c0_25] : memref<1x16x1xf32, #tpu.memory_space<vmem>>, vector<1x16x1xf32>
      tpu.vector_store %arg7[%c0_23, %c0_24, %c0_25], %26 {strides = array<i32>} : memref<1x16x1xf32, #tpu.memory_space<vmem>>, vector<1x16x1xf32>,
      %cst_26 = arith.constant 0.000000e+00 : f32
      %28 = vector.broadcast %cst_26 : f32 to vector<1x16x1xf32>
      %c0_27 = arith.constant 0 : index
      %c0_28 = arith.constant 0 : index
      %c0_29 = arith.constant 0 : index
      %29 = vector.load %arg8[%c0_27, %c0_28, %c0_29] : memref<1x16x1xf32, #tpu.memory_space<vmem>>, vector<1x16x1xf32>
      tpu.vector_store %arg8[%c0_27, %c0_28, %c0_29], %28 {strides = array<i32>} : memref<1x16x1xf32, #tpu.memory_space<vmem>>, vector<1x16x1xf32>,
    } else {
    }
    %c0 = arith.constant 0 : index
    %c0_4 = arith.constant 0 : index
    %c0_5 = arith.constant 0 : index
    %8 = vector.load %arg2[%c0, %c0_4, %c0_5] : memref<2x16x256xf32, #tpu.memory_space<vmem>>, vector<2x16x256xf32>
    %cst = arith.constant dense<0.000000e+00> : vector<2x16xf32>
    %9 = vector.multi_reduction <add>, %8, %cst [2] : vector<2x16x256xf32> to vector<2x16xf32>
    %10 = vector.shape_cast %9 : vector<2x16xf32> to vector<2x16x1xf32>
    %cst_6 = arith.constant dense<0.000000e+00> : vector<16x1xf32>
    %11 = vector.multi_reduction <add>, %10, %cst_6 [0] : vector<2x16x1xf32> to vector<16x1xf32>
    %12 = vector.shape_cast %11 : vector<16x1xf32> to vector<1x16x1xf32>
    %13 = arith.mulf %8, %8 : vector<2x16x256xf32>
    %cst_7 = arith.constant dense<0.000000e+00> : vector<2x16xf32>
    %14 = vector.multi_reduction <add>, %13, %cst_7 [2] : vector<2x16x256xf32> to vector<2x16xf32>
    %15 = vector.shape_cast %14 : vector<2x16xf32> to vector<2x16x1xf32>
    %cst_8 = arith.constant dense<0.000000e+00> : vector<16x1xf32>
    %16 = vector.multi_reduction <add>, %15, %cst_8 [0] : vector<2x16x1xf32> to vector<16x1xf32>
    %17 = vector.shape_cast %16 : vector<16x1xf32> to vector<1x16x1xf32>
    %c0_9 = arith.constant 0 : index
    %c0_10 = arith.constant 0 : index
    %c0_11 = arith.constant 0 : index
    %18 = vector.load %arg7[%c0_9, %c0_10, %c0_11] : memref<1x16x1xf32, #tpu.memory_space<vmem>>, vector<1x16x1xf32>
    %19 = arith.addf %18, %12 : vector<1x16x1xf32>
    %c0_12 = arith.constant 0 : index
    %c0_13 = arith.constant 0 : index
    %c0_14 = arith.constant 0 : index
    %20 = vector.load %arg7[%c0_12, %c0_13, %c0_14] : memref<1x16x1xf32, #tpu.memory_space<vmem>>, vector<1x16x1xf32>
    tpu.vector_store %arg7[%c0_12, %c0_13, %c0_14], %19 {strides = array<i32>} : memref<1x16x1xf32, #tpu.memory_space<vmem>>, vector<1x16x1xf32>,
    %c0_15 = arith.constant 0 : index
    %c0_16 = arith.constant 0 : index
    %c0_17 = arith.constant 0 : index
    %21 = vector.load %arg8[%c0_15, %c0_16, %c0_17] : memref<1x16x1xf32, #tpu.memory_space<vmem>>, vector<1x16x1xf32>
    %22 = arith.addf %21, %17 : vector<1x16x1xf32>
    %c0_18 = arith.constant 0 : index
    %c0_19 = arith.constant 0 : index
    %c0_20 = arith.constant 0 : index
    %23 = vector.load %arg8[%c0_18, %c0_19, %c0_20] : memref<1x16x1xf32, #tpu.memory_space<vmem>>, vector<1x16x1xf32>
    tpu.vector_store %arg8[%c0_18, %c0_19, %c0_20], %22 {strides = array<i32>} : memref<1x16x1xf32, #tpu.memory_space<vmem>>, vector<1x16x1xf32>,
    %24 = arith.extui %5 : i1 to i32
    %c0_i32_21 = arith.constant 0 : i32
    %25 = arith.cmpi ne, %24, %c0_i32_21 : i32
    scf.if %25 {
      %c0_22 = arith.constant 0 : index
      %c0_23 = arith.constant 0 : index
      %c0_24 = arith.constant 0 : index
      %26 = vector.load %arg7[%c0_22, %c0_23, %c0_24] : memref<1x16x1xf32, #tpu.memory_space<vmem>>, vector<1x16x1xf32>
      %cst_25 = arith.constant 0.001953125 : f32
      %27 = vector.broadcast %cst_25 : f32 to vector<1x16x1xf32>
      %28 = arith.mulf %26, %27 : vector<1x16x1xf32>
      %c0_26 = arith.constant 0 : index
      %c0_27 = arith.constant 0 : index
      %c0_28 = arith.constant 0 : index
      %29 = vector.load %arg8[%c0_26, %c0_27, %c0_28] : memref<1x16x1xf32, #tpu.memory_space<vmem>>, vector<1x16x1xf32>
      %cst_29 = arith.constant 0.001953125 : f32
      %30 = vector.broadcast %cst_29 : f32 to vector<1x16x1xf32>
      %31 = arith.mulf %29, %30 : vector<1x16x1xf32>
      %32 = arith.mulf %28, %28 : vector<1x16x1xf32>
      %33 = arith.subf %31, %32 : vector<1x16x1xf32>
      %cst_30 = arith.constant 9.99999974E-6 : f32
      %34 = vector.broadcast %cst_30 : f32 to vector<1x16x1xf32>
      %35 = arith.addf %33, %34 : vector<1x16x1xf32>
      %36 = math.rsqrt %35 : vector<1x16x1xf32>
      %c0_31 = arith.constant 0 : index
      %c0_32 = arith.constant 0 : index
      %c0_33 = arith.constant 0 : index
      %37 = vector.load %arg3[%c0_31, %c0_32, %c0_33] : memref<1x16x1xf32, #tpu.memory_space<vmem>>, vector<1x16x1xf32>
      %38 = arith.mulf %37, %36 : vector<1x16x1xf32>
      %cst_34 = arith.constant 1.000000e+00 : f32
      %39 = vector.broadcast %cst_34 : f32 to vector<1x16x1xf32>
      %40 = arith.addf %38, %39 : vector<1x16x1xf32>
      %c0_35 = arith.constant 0 : index
      %c0_36 = arith.constant 0 : index
      %c0_37 = arith.constant 0 : index
      %41 = vector.load %arg5[%c0_35, %c0_36, %c0_37] : memref<1x16x1xf32, #tpu.memory_space<vmem>>, vector<1x16x1xf32>
      tpu.vector_store %arg5[%c0_35, %c0_36, %c0_37], %40 {strides = array<i32>} : memref<1x16x1xf32, #tpu.memory_space<vmem>>, vector<1x16x1xf32>,
      %c0_38 = arith.constant 0 : index
      %c0_39 = arith.constant 0 : index
      %c0_40 = arith.constant 0 : index
      %42 = vector.load %arg4[%c0_38, %c0_39, %c0_40] : memref<1x16x1xf32, #tpu.memory_space<vmem>>, vector<1x16x1xf32>
      %43 = arith.mulf %28, %38 : vector<1x16x1xf32>
      %44 = arith.subf %42, %43 : vector<1x16x1xf32>
      %c0_41 = arith.constant 0 : index
      %c0_42 = arith.constant 0 : index
      %c0_43 = arith.constant 0 : index
      %45 = vector.load %arg6[%c0_41, %c0_42, %c0_43] : memref<1x16x1xf32, #tpu.memory_space<vmem>>, vector<1x16x1xf32>
      tpu.vector_store %arg6[%c0_41, %c0_42, %c0_43], %44 {strides = array<i32>} : memref<1x16x1xf32, #tpu.memory_space<vmem>>, vector<1x16x1xf32>,
    } else {
    }
    return
  }
  func.func @transform_0(%arg0: i32, %arg1: i32) -> (i32, i32, i32) {
    %c0_i32 = arith.constant 0 : i32
    %c0_i32_0 = arith.constant 0 : i32
    return %arg0, %c0_i32, %arg1 : i32, i32, i32
  }
  func.func @transform_1(%arg0: i32, %arg1: i32) -> (i32, i32, i32) {
    %c0_i32 = arith.constant 0 : i32
    %c0_i32_0 = arith.constant 0 : i32
    %c0_i32_1 = arith.constant 0 : i32
    %c0_i32_2 = arith.constant 0 : i32
    return %c0_i32, %c0_i32_0, %c0_i32_1 : i32, i32, i32
  }
  func.func @transform_2(%arg0: i32, %arg1: i32) -> (i32, i32, i32) {
    %c0_i32 = arith.constant 0 : i32
    %c0_i32_0 = arith.constant 0 : i32
    %c0_i32_1 = arith.constant 0 : i32
    %c0_i32_2 = arith.constant 0 : i32
    return %c0_i32, %c0_i32_0, %c0_i32_1 : i32, i32, i32
  }
  func.func @transform_3(%arg0: i32, %arg1: i32) -> (i32, i32, i32) {
    %c0_i32 = arith.constant 0 : i32
    %c0_i32_0 = arith.constant 0 : i32
    %c0_i32_1 = arith.constant 0 : i32
    %c0_i32_2 = arith.constant 0 : i32
    return %c0_i32, %c0_i32_0, %c0_i32_1 : i32, i32, i32
  }
  func.func @transform_4(%arg0: i32, %arg1: i32) -> (i32, i32, i32) {
    %c0_i32 = arith.constant 0 : i32
    %c0_i32_0 = arith.constant 0 : i32
    %c0_i32_1 = arith.constant 0 : i32
    %c0_i32_2 = arith.constant 0 : i32
    return %c0_i32, %c0_i32_0, %c0_i32_1 : i32, i32, i32
  }
}

</mosaic_0001>

<bundles_post_ra>
// kernel: tpu_custom_call.1
= control target key start
LH: loop header
LB: loop body
LE: loop exit
PB: predicated region body
PF: predicated region fallthrough
CT: control target
= control target key end

     0   :  { %10 = vsyncpa [#allocation5], 0  ;;  %s173_s15 = smov [#allocation4]   ;;  %s250_s0 = inlined_call_operand.hbm [shape: f32[2,16,256], index: 0, kind: input, shape index: {}]   ;;  %s251_s1 = inlined_call_operand.vmem [shape: f32[1,16,1], index: 1, kind: input, shape index: {}]   ;;  %s252_s2 = inlined_call_operand.vmem [shape: f32[1,16,1], index: 2, kind: input, shape index: {}]   ;;  %s253_s3 = inlined_call_operand.vmem [shape: f32[1,16,1], index: 3, kind: output, shape index: {0}]   ;;  %s254_s4 = inlined_call_operand.vmem [shape: f32[1,16,1], index: 4, kind: output, shape index: {1}]  }
   0x1   :  { %s16_s16 = sshll.u32 %s173_s15, 4  ;;  %s149_s19 = scalar_lea.hbm %s250_s0, 1024  ;;  %s17_s16 = int_to_ptr.vmem [resolvable:$true] %s16_s16 }
   0x2   :  { %p150_p0 = scmp.ne.s32.totalorder %s250_s0, %s149_s19  ;;  %p153_p1 = scmp.lt.u32.totalorder %s149_s19, %s250_s0 }
   0x4   :  { %p155_p2 = pnand %p153_p1, %p150_p0 }
   0x6   :  { %158 = shalt.err (!%p155_p2)
}
   0x7   :  { %s159_s24 = scalar_lea.vmem %s17_s16, 1024  ;;  %p164_p4 = scmp.lt.s32.totalorder %s17_s16, %s17_s16 }
   0x8   :  { %p160_p3 = scmp.ne.s32.totalorder %s17_s16, %s159_s24  ;;  %p165_p5 = scmp.lt.s32.totalorder %s159_s24, %s159_s24 }
   0xa   :  { %p166_p6 = por %p165_p5, %p164_p4 }
   0xc   :  { %p167_p7 = pnand %p166_p6, %p160_p3 }
   0xe   :  { %170 = shalt.err (!%p167_p7)
}
   0xf   :  { %s174_s25 = smov 256   ;;  %s175_s26 = smov 16  }
  0x10   :  { %22 = dma.hbm_to_vmem [thread:$0]  %s250_s0, 1024, %s17_s16, [#allocation5], %s174_s25, %s174_s25, %s175_s26  }
  0x11   :  { %171 = dma.done.wait [#allocation5], 1024  }
  0x12   :  { %172 = vsyncadd [#allocation5], 4294966272  ;;  %v45_v0 = vld [vmem:[#allocation4 + $0x20] sm:$0xff]  ;;  %v46_v1 = vld [vmem:[#allocation4 + $0x28] sm:$0xff]  ;;  %vm36_vm0 = vcmask 7168   ;;  %v176_v24 = vmov 0.0  }
  0x13   :  { %v41_v2 = vld [vmem:[#allocation4] sm:$0xff]  ;;  %v55_v3 = vadd.f32 %v46_v1, %v45_v0  ;;  %v42_v4 = vld [vmem:[#allocation4 + $0x8] sm:$0xff]  ;;  %v47_v5 = vld [vmem:[#allocation4 + $0x30] sm:$0xff]  ;;  %v67_v19 = vmul.f32 %v45_v0, %v45_v0  ;;  %v68_v20 = vmul.f32 %v46_v1, %v46_v1  ;;  %37 = vst.msk [vmem:[#allocation2] sm:$0xff] %vm36_vm0, %v176_v24 }
  0x14   :  { %v48_v6 = vld [vmem:[#allocation4 + $0x38] sm:$0xff]  ;;  %v49_v7 = vadd.f32 %v42_v4, %v41_v2  ;;  %v43_v8 = vld [vmem:[#allocation4 + $0x10] sm:$0xff]  ;;  %v63_v13 = vmul.f32 %v41_v2, %v41_v2  ;;  %v64_v14 = vmul.f32 %v42_v4, %v42_v4  ;;  %v69_v17 = vmul.f32 %v47_v5, %v47_v5  ;;  %38 = vst.msk [vmem:[#allocation2 + $0x8] sm:$0xff] %vm36_vm0, %v176_v24  ;;  %v117_v59 = vld [vmem:[%s251_s1 + $0x8] sm:$0xff] }
  0x15   :  { %v44_v9 = vld [vmem:[#allocation4 + $0x18] sm:$0xff]  ;;  %56 = vadd.xlane.f32.xlu1 %v55_v3  ;;  %v58_v10 = vadd.f32 %v48_v6, %v47_v5  ;;  %v65_v11 = vmul.f32 %v43_v8, %v43_v8  ;;  %v70_v18 = vmul.f32 %v48_v6, %v48_v6  ;;  %v77_v23 = vadd.f32 %v68_v20, %v67_v19  ;;  %v116_v60 = vld [vmem:[%s251_s1] sm:$0xff]  ;;  %v125_v0 = vld [vmem:[%s252_s2 + $0x8] sm:$0xff] }
  0x16   :  { %v66_v12 = vmul.f32 %v44_v9, %v44_v9  ;;  %50 = vadd.xlane.f32.xlu0 %v49_v7  ;;  %v52_v15 = vadd.f32 %v44_v9, %v43_v8  ;;  %v71_v21 = vadd.f32 %v64_v14, %v63_v13  ;;  %39 = vst.msk [vmem:[#allocation3] sm:$0xff] %vm36_vm0, %v176_v24  ;;  %40 = vst.msk [vmem:[#allocation3 + $0x8] sm:$0xff] %vm36_vm0, %v176_v24  ;;  %v124_v4 = vld [vmem:[%s252_s2] sm:$0xff] }
  0x17   :  { %v80_v22 = vadd.f32 %v70_v18, %v69_v17 }
  0x18   :  { %v74_v16 = vadd.f32 %v66_v12, %v65_v11 }
  0x19   :  { %59 = vadd.xlane.f32.xlu1 %v58_v10 }
  0x1a   :  { %53 = vadd.xlane.f32.xlu0 %v52_v15  ;;  %v85_v27 = vld [vmem:[#allocation2] sm:$0xff] }
  0x1b   :  { %v86_v32 = vld [vmem:[#allocation2 + $0x8] sm:$0xff] }
  0x1d   :  { %75 = vadd.xlane.f32.xlu1 %v74_v16  ;;  %v93_v38 = vld [vmem:[#allocation3 + $0x8] sm:$0xff]  ;;  %v92_v41 = vld [vmem:[#allocation3] sm:$0xff] }
  0x1e   :  { %72 = vadd.xlane.f32.xlu0 %v71_v21 }
  0x21   :  { %81 = vadd.xlane.f32.xlu1 %v80_v22 }
  0x22   :  { %78 = vadd.xlane.f32.xlu0 %v77_v23 }
  0xa2   :  { %v57_v25 = vpop.xlane.xlu1 %56 }
  0xa3   :  { %v51_v26 = vpop.xlane.xlu0 %50 }
  0xa4   :  { %v61_v28 = vadd.f32 %v57_v25, %v51_v26 }
  0xa6   :  { %v87_v29 = vadd.f32 %v85_v27, %v61_v28  ;;  %v60_v30 = vpop.xlane.xlu1 %59 }
  0xa7   :  { %v54_v31 = vpop.xlane.xlu0 %53 }
  0xa8   :  { %90 = vst.msk [vmem:[#allocation2] sm:$0xff] %vm36_vm0, %v87_v29  ;;  %v62_v33 = vadd.f32 %v60_v30, %v54_v31 }
  0xaa   :  { %v88_v34 = vadd.f32 %v86_v32, %v62_v33  ;;  %v76_v35 = vpop.xlane.xlu1 %75 }
  0xab   :  { %v73_v36 = vpop.xlane.xlu0 %72 }
  0xac   :  { %91 = vst.msk [vmem:[#allocation2 + $0x8] sm:$0xff] %vm36_vm0, %v88_v34 }
  0xae   :  { %v82_v37 = vpop.xlane.xlu1 %81 }
  0xaf   :  { %v84_v39 = vadd.f32 %v82_v37, %v76_v35  ;;  %v79_v40 = vpop.xlane.xlu0 %78  ;;  %v100_v46 = vld [vmem:[#allocation2] sm:$0xff] }
  0xb0   :  { %v83_v42 = vadd.f32 %v79_v40, %v73_v36  ;;  %v102_v48 = vmul.f32 0.001953125, %v100_v46 }
  0xb1   :  { %v95_v43 = vadd.f32 %v93_v38, %v84_v39 }
  0xb2   :  { %v94_v44 = vadd.f32 %v92_v41, %v83_v42  ;;  %v108_v53 = vmul.f32 %v102_v48, %v102_v48 }
  0xb3   :  { %97 = vst.msk [vmem:[#allocation3 + $0x8] sm:$0xff] %vm36_vm0, %v95_v43  ;;  %v101_v45 = vld [vmem:[#allocation2 + $0x8] sm:$0xff] }
  0xb4   :  { %96 = vst.msk [vmem:[#allocation3] sm:$0xff] %vm36_vm0, %v94_v44  ;;  %v103_v47 = vmul.f32 0.001953125, %v101_v45 }
  0xb6   :  { %v109_v50 = vmul.f32 %v103_v47, %v103_v47 }
  0xba   :  { %v105_v49 = vld [vmem:[#allocation3 + $0x8] sm:$0xff] }
  0xbb   :  { %v107_v51 = vmul.f32 0.001953125, %v105_v49  ;;  %v104_v52 = vld [vmem:[#allocation3] sm:$0xff] }
  0xbc   :  { %v106_v54 = vmul.f32 0.001953125, %v104_v52 }
  0xbd   :  { %v111_v55 = vsub.f32 %v107_v51, %v109_v50 }
  0xbe   :  { %v110_v56 = vsub.f32 %v106_v54, %v108_v53 }
  0xbf   :  { %v113_v57 = vadd.f32 1e-05, %v111_v55 }
  0xc0   :  { %v112_v58 = vadd.f32 1e-05, %v110_v56 }
  0xc1   :  { %145 = vrsqrt.f32 %v113_v57 }
  0xc2   :  { %147 = vrsqrt.f32 %v112_v58 }
  0xcb   :  { %v146_v61 = vpop.eup %145 }
  0xcc   :  { %v148_v62 = vpop.eup %147  ;;  %v119_v63 = vmul.f32 %v146_v61, %v117_v59 }
  0xcd   :  { %v118_v1 = vmul.f32 %v148_v62, %v116_v60 }
  0xce   :  { %v121_v2 = vadd.f32 1.0, %v119_v63  ;;  %v127_v3 = vmul.f32 %v119_v63, %v103_v47 }
  0xcf   :  { %v120_v5 = vadd.f32 1.0, %v118_v1  ;;  %v126_v6 = vmul.f32 %v118_v1, %v102_v48 }
  0xd0   :  { %123 = vst.msk [vmem:[%s253_s3 + $0x8] sm:$0xff] %vm36_vm0, %v121_v2  ;;  %v129_v7 = vsub.f32 %v125_v0, %v127_v3 }
  0xd1   :  { %122 = vst.msk [vmem:[%s253_s3] sm:$0xff] %vm36_vm0, %v120_v5  ;;  %v128_v8 = vsub.f32 %v124_v4, %v126_v6 }
  0xd2   :  { %131 = vst.msk [vmem:[%s254_s4 + $0x8] sm:$0xff] %vm36_vm0, %v129_v7 }
  0xd3   :  { %130 = vst.msk [vmem:[%s254_s4] sm:$0xff] %vm36_vm0, %v128_v8 }
  0xd4   :  { %140 = vsyncpa [#allocation5], 1 }

</bundles_post_ra>
